<compile_context>
chip_gen: v6e
topology: v6e:2x2x1
jax: 0.10.0
libtpu: 0.0.40
codegen_flags: <defaults>
</compile_context>

<pallas_src>
import functools

import jax
import jax.numpy as jnp
from jax.experimental import pallas as pl
from jax.experimental.pallas import tpu as pltpu


def _round_up(n, m):
    return ((n + m - 1) // m) * m


def _densenet_kernel(x_ref, w_in_ref, b_in_ref, w_hid_ref, b_hid_ref,
                     w_out_ref, b_out_ref, o_ref, h_ref):
    """One grid step = one hidden layer applied to one batch tile.

    grid = (batch_tiles, num_hidden); batch "parallel", layer "arbitrary".

    x_ref:     (Tm, K_pad)         input tile (compute dtype)     idx (m, 0)
    w_in_ref:  (K_pad, W_pad)      input-layer weight (resident)  idx (0, 0)
    b_in_ref:  (1, W_pad) f32      input-layer bias (resident)    idx (0, 0)
    w_hid_ref: (1, W_pad, W_pad)   hidden weight, streamed        idx (l, 0, 0)
    b_hid_ref: (1, 1, W_pad) f32   hidden bias, streamed          idx (l, 0, 0)
    w_out_ref: (W_pad, N_pad)      output weight (resident)       idx (0, 0)
    b_out_ref: (1, N_pad) f32      output bias (resident)         idx (0, 0)
    o_ref:     (Tm, N_pad) f32     logits tile (resident over l)  idx (m, 0)
    h_ref:     (Tm, W_pad)         persistent activation scratch (compute dtype)
    """
    l = pl.program_id(1)

    # Input layer: h = relu(x @ W_in + b_in)   (first layer step of this tile).
    @pl.when(l == 0)
    def _():
        acc = jnp.dot(x_ref[...], w_in_ref[...],
                      preferred_element_type=jnp.float32)
        h_ref[...] = jnp.maximum(acc + b_in_ref[...], 0.0).astype(h_ref.dtype)

    # Hidden layer l: h = relu(h @ W_hid[l] + b_hid[l]).
    # Activation stays resident in VMEM; this layer's weight block was
    # double-buffer-prefetched by the BlockSpec pipeline during layer l-1.
    acc = jnp.dot(h_ref[...], w_hid_ref[0],
                  preferred_element_type=jnp.float32)
    h_ref[...] = jnp.maximum(acc + b_hid_ref[0], 0.0).astype(h_ref.dtype)

    # Output layer (no ReLU), only on the last layer step.
    @pl.when(l == pl.num_programs(1) - 1)
    def _():
        acc = jnp.dot(h_ref[...], w_out_ref[...],
                      preferred_element_type=jnp.float32)
        o_ref[...] = acc + b_out_ref[...]


def init_densenet_params(key, input_size, num_layers, width, out_dim=10):
    """PyTorch-style Linear init (uniform(-1/sqrt(fan_in), 1/sqrt(fan_in))).
    Weights stored transposed as (in_features, out_features)."""
    dims = [input_size] + [width] * (num_layers + 1) + [out_dim]
    params = []
    for fan_in, fan_out in zip(dims[:-1], dims[1:]):
        key, kw, kb = jax.random.split(key, 3)
        bound = 1.0 / jnp.sqrt(fan_in)
        w = jax.random.uniform(kw, (fan_in, fan_out), jnp.float32, -bound, bound)
        b = jax.random.uniform(kb, (fan_out,), jnp.float32, -bound, bound)
        params.append((w, b))
    return params


def pack_densenet_params(params, *, param_dtype=jnp.float32):
    """Zero-pad feature dims to multiples of 128, split input/hidden/output
    layers, and optionally store weights in bf16 for the MXU (f32 biases)."""
    assert len(params) >= 2, "expected at least input layer and output layer"
    input_size, width = params[0][0].shape
    out_dim = params[-1][0].shape[1]

    k_pad = max(_round_up(input_size, 128), 128)
    w_pad = max(_round_up(width, 128), 128)
    n_pad = max(_round_up(out_dim, 128), 128)

    def pad_w(w, rows, cols):
        full = jnp.zeros((rows, cols), jnp.float32).at[:w.shape[0], :w.shape[1]].set(w)
        return full.astype(param_dtype)

    def pad_b(b, cols):
        return jnp.zeros((cols,), jnp.float32).at[:b.shape[0]].set(b)

    w_in = pad_w(params[0][0], k_pad, w_pad)
    b_in = pad_b(params[0][1], w_pad).reshape(1, w_pad)

    hidden = params[1:-1]
    if hidden:
        w_hid = jnp.stack([pad_w(w, w_pad, w_pad) for (w, _) in hidden])
        b_hid = jnp.stack([pad_b(b, w_pad) for (_, b) in hidden])
    else:
        # num_layers == 0: keep the streamed layer axis non-empty with an exact
        # identity layer (relu(h @ I + 0) == h because h >= 0 after the input ReLU).
        w_hid = jnp.eye(w_pad, dtype=jnp.float32)[None].astype(param_dtype)
        b_hid = jnp.zeros((1, w_pad), jnp.float32)
    b_hid = b_hid.reshape(b_hid.shape[0], 1, w_pad)

    w_out = pad_w(params[-1][0], w_pad, n_pad)
    b_out = pad_b(params[-1][1], n_pad).reshape(1, n_pad)

    return dict(w_in=w_in, b_in=b_in, w_hid=w_hid, b_hid=b_hid,
                w_out=w_out, b_out=b_out)


@functools.partial(jax.jit, static_argnames=("out_dim",))
def densenet_forward(packed, x, *, out_dim=10):
    """Forward pass: ReLU on every layer except the last; one fused kernel."""
    w_in, b_in = packed["w_in"], packed["b_in"]
    w_hid, b_hid = packed["w_hid"], packed["b_hid"]
    w_out, b_out = packed["w_out"], packed["b_out"]

    compute_dtype = w_in.dtype                       # f32 or bf16 storage
    itemsize = jnp.dtype(compute_dtype).itemsize
    batch, input_size = x.shape
    k_pad, w_pad_dim = w_in.shape
    num_hidden = w_hid.shape[0]
    n_pad = w_out.shape[1]

    # Batch tiling: full MXU width (256 rows) for large batches; otherwise the
    # whole sublane-padded batch (8 rows f32 / 16 rows bf16) in one tile.
    sub = 8 * (4 // itemsize)
    if batch > 256:
        tm = 256
        m_pad = _round_up(batch, tm)
    else:
        m_pad = max(_round_up(batch, sub), sub)
        tm = m_pad
    num_m_tiles = m_pad // tm

    x_pad = (jnp.zeros((m_pad, k_pad), compute_dtype)
             .at[:batch, :input_size].set(x.astype(compute_dtype)))

    # VMEM budget: double-buffer every streamed/resident block + output tile
    # + activation scratch, with headroom; clamped to the v7x 64 MiB ceiling.
    footprint = 2 * (tm * k_pad * itemsize                 # x tile
                     + k_pad * w_pad_dim * itemsize        # w_in
                     + w_pad_dim * 4                       # b_in
                     + w_pad_dim * w_pad_dim * itemsize    # streamed w_hid block
                     + w_pad_dim * 4                       # streamed b_hid block
                     + w_pad_dim * n_pad * itemsize        # w_out
                     + n_pad * 4                           # b_out
                     + tm * n_pad * 4)                     # output tile
    footprint += tm * w_pad_dim * itemsize                 # activation scratch
    vmem_limit = int(min(64 * 1024 * 1024,
                         max(footprint + 8 * 1024 * 1024, 16 * 1024 * 1024)))

    out_pad = pl.pallas_call(
        _densenet_kernel,
        out_shape=jax.ShapeDtypeStruct((m_pad, n_pad), jnp.float32),
        grid_spec=pltpu.PrefetchScalarGridSpec(
            num_scalar_prefetch=0,
            grid=(num_m_tiles, num_hidden),
            in_specs=[
                pl.BlockSpec((tm, k_pad), lambda m, l: (m, 0)),
                pl.BlockSpec((k_pad, w_pad_dim), lambda m, l: (0, 0)),
                pl.BlockSpec((1, w_pad_dim), lambda m, l: (0, 0)),
                pl.BlockSpec((1, w_pad_dim, w_pad_dim), lambda m, l: (l, 0, 0)),
                pl.BlockSpec((1, 1, w_pad_dim), lambda m, l: (l, 0, 0)),
                pl.BlockSpec((w_pad_dim, n_pad), lambda m, l: (0, 0)),
                pl.BlockSpec((1, n_pad), lambda m, l: (0, 0)),
            ],
            out_specs=pl.BlockSpec((tm, n_pad), lambda m, l: (m, 0)),
            scratch_shapes=[pltpu.VMEM((tm, w_pad_dim), compute_dtype)],
        ),
        compiler_params=pltpu.CompilerParams(
            dimension_semantics=("parallel", "arbitrary"),
            vmem_limit_bytes=vmem_limit,
        ),
    )(x_pad, w_in, b_in, w_hid, b_hid, w_out, b_out)

    return out_pad[:batch, :out_dim]


def densenet_forward_ref(params, x):
    """Pure-JAX f32 reference for correctness check."""
    n = len(params)
    h = x
    for i, (w, b) in enumerate(params):
        h = h @ w + b
        if i < n - 1:
            h = jnp.maximum(h, 0.0)
    return h


if __name__ == "__main__":
    # Densenet(input_size=32, num_layers=2, width=64), batch=2.
    input_size, num_layers, width, batch = 32, 2, 64, 2

    key = jax.random.PRNGKey(0)
    key, kx = jax.random.split(key)
    x = jax.random.normal(kx, (batch, input_size), jnp.float32)
    params = init_densenet_params(key, input_size, num_layers, width)
    ref = densenet_forward_ref(params, x)

    # f32 path: exact match with the reference.
    packed_f32 = pack_densenet_params(params, param_dtype=jnp.float32)
    out = jax.block_until_ready(densenet_forward(packed_f32, x, out_dim=10))
    assert out.shape == (batch, 10)
    assert jnp.allclose(out, ref, atol=1e-5, rtol=1e-5)

    # bf16 weights + bf16 activation scratch, f32 accumulation: same kernel.
    # (Activations are re-quantized to bf16 each layer -> looser tolerance.)
    packed_bf16 = pack_densenet_params(params, param_dtype=jnp.bfloat16)
    out_bf16 = jax.block_until_ready(densenet_forward(packed_bf16, x, out_dim=10))
    assert out_bf16.shape == (batch, 10)
    assert jnp.allclose(out_bf16, ref, atol=1e-1, rtol=1e-1)

    # num_layers == 0 (no hidden layer): handled via an exact identity layer.
    params0 = init_densenet_params(key, input_size, 0, width)
    ref0 = densenet_forward_ref(params0, x)
    packed0 = pack_densenet_params(params0, param_dtype=jnp.float32)
    out0 = jax.block_until_ready(densenet_forward(packed0, x, out_dim=10))
    assert jnp.allclose(out0, ref0, atol=1e-5, rtol=1e-5)

    print("KERNEL_OK")
</pallas_src>

<mosaic_0001>
module attributes {stable_mosaic.version = 11 : i64} {
  func.func @_densenet_kernel(%arg0: i32, %arg1: i32, %arg2: memref<8x128xf32, #tpu.memory_space<vmem>>, %arg3: memref<128x128xf32, #tpu.memory_space<vmem>>, %arg4: memref<1x128xf32, #tpu.memory_space<vmem>>, %arg5: memref<1x128x128xf32, #tpu.memory_space<vmem>>, %arg6: memref<1x1x128xf32, #tpu.memory_space<vmem>>, %arg7: memref<128x128xf32, #tpu.memory_space<vmem>>, %arg8: memref<1x128xf32, #tpu.memory_space<vmem>>, %arg9: memref<8x128xf32, #tpu.memory_space<vmem>>, %arg10: memref<8x128xf32, #tpu.memory_space<vmem>>) attributes {dimension_semantics = [#tpu.dimension_semantics<parallel>, #tpu.dimension_semantics<arbitrary>], iteration_bounds = array<i64: 1, 2>, scalar_prefetch = 0 : i64, scratch_operands = 1 : i64, tpu.core_type = #tpu.core_type<tc>, window_params = [{transform_indices = @transform_0, window_bounds = array<i64: 8, 128>}, {pipeline_mode = #tpu.pipeline_mode<synchronous>, transform_indices = @transform_1, window_bounds = array<i64: 128, 128>}, {pipeline_mode = #tpu.pipeline_mode<synchronous>, transform_indices = @transform_2, window_bounds = array<i64: 1, 128>}, {transform_indices = @transform_3, window_bounds = array<i64: 1, 128, 128>}, {transform_indices = @transform_4, window_bounds = array<i64: 1, 1, 128>}, {pipeline_mode = #tpu.pipeline_mode<synchronous>, transform_indices = @transform_5, window_bounds = array<i64: 128, 128>}, {pipeline_mode = #tpu.pipeline_mode<synchronous>, transform_indices = @transform_6, window_bounds = array<i64: 1, 128>}, {transform_indices = @transform_7, window_bounds = array<i64: 8, 128>}]} {
    %c0_i32 = arith.constant 0 : i32
    %0 = arith.cmpi eq, %arg1, %c0_i32 : i32
    %1 = arith.extui %0 : i1 to i32
    %c0_i32_0 = arith.constant 0 : i32
    %2 = arith.cmpi ne, %1, %c0_i32_0 : i32
    scf.if %2 {
      %c0_12 = arith.constant 0 : index
      %c0_13 = arith.constant 0 : index
      %17 = vector.load %arg2[%c0_12, %c0_13] : memref<8x128xf32, #tpu.memory_space<vmem>>, vector<8x128xf32>
      %c0_14 = arith.constant 0 : index
      %c0_15 = arith.constant 0 : index
      %18 = vector.load %arg3[%c0_14, %c0_15] : memref<128x128xf32, #tpu.memory_space<vmem>>, vector<128x128xf32>
      %cst_16 = arith.constant dense<0.000000e+00> : vector<8x128xf32>
      %19 = tpu.matmul %17, %18, %cst_16 {dimension_numbers = #tpu.dot_dimension_numbers<[1], [0], [0], [1], [0, 0, 1, 1], [], []>} : vector<8x128xf32>, vector<128x128xf32>, vector<8x128xf32> -> vector<8x128xf32>
      %c0_17 = arith.constant 0 : index
      %c0_18 = arith.constant 0 : index
      %20 = vector.load %arg4[%c0_17, %c0_18] : memref<1x128xf32, #tpu.memory_space<vmem>>, vector<1x128xf32>
      %21 = vector.broadcast %20 : vector<1x128xf32> to vector<8x128xf32>
      %22 = arith.addf %19, %21 : vector<8x128xf32>
      %cst_19 = arith.constant 0.000000e+00 : f32
      %23 = vector.broadcast %cst_19 : f32 to vector<8x128xf32>
      %24 = arith.maximumf %22, %23 : vector<8x128xf32>
      %c0_20 = arith.constant 0 : index
      %c0_21 = arith.constant 0 : index
      %25 = vector.load %arg10[%c0_20, %c0_21] : memref<8x128xf32, #tpu.memory_space<vmem>>, vector<8x128xf32>
      tpu.vector_store %arg10[%c0_20, %c0_21], %24 {strides = array<i32>} : memref<8x128xf32, #tpu.memory_space<vmem>>, vector<8x128xf32>,
    } else {
    }
    %c0 = arith.constant 0 : index
    %c0_1 = arith.constant 0 : index
    %3 = vector.load %arg10[%c0, %c0_1] : memref<8x128xf32, #tpu.memory_space<vmem>>, vector<8x128xf32>
    %c0_2 = arith.constant 0 : index
    %c0_3 = arith.constant 0 : index
    %c0_4 = arith.constant 0 : index
    %4 = vector.load %arg5[%c0_2, %c0_3, %c0_4] : memref<1x128x128xf32, #tpu.memory_space<vmem>>, vector<1x128x128xf32>
    %5 = vector.shape_cast %4 : vector<1x128x128xf32> to vector<128x128xf32>
    %cst = arith.constant dense<0.000000e+00> : vector<8x128xf32>
    %6 = tpu.matmul %3, %5, %cst {dimension_numbers = #tpu.dot_dimension_numbers<[1], [0], [0], [1], [0, 0, 1, 1], [], []>} : vector<8x128xf32>, vector<128x128xf32>, vector<8x128xf32> -> vector<8x128xf32>
    %c0_5 = arith.constant 0 : index
    %c0_6 = arith.constant 0 : index
    %c0_7 = arith.constant 0 : index
    %7 = vector.load %arg6[%c0_5, %c0_6, %c0_7] : memref<1x1x128xf32, #tpu.memory_space<vmem>>, vector<1x1x128xf32>
    %8 = vector.shape_cast %7 : vector<1x1x128xf32> to vector<1x128xf32>
    %9 = vector.broadcast %8 : vector<1x128xf32> to vector<8x128xf32>
    %10 = arith.addf %6, %9 : vector<8x128xf32>
    %cst_8 = arith.constant 0.000000e+00 : f32
    %11 = vector.broadcast %cst_8 : f32 to vector<8x128xf32>
    %12 = arith.maximumf %10, %11 : vector<8x128xf32>
    %c0_9 = arith.constant 0 : index
    %c0_10 = arith.constant 0 : index
    %13 = vector.load %arg10[%c0_9, %c0_10] : memref<8x128xf32, #tpu.memory_space<vmem>>, vector<8x128xf32>
    tpu.vector_store %arg10[%c0_9, %c0_10], %12 {strides = array<i32>} : memref<8x128xf32, #tpu.memory_space<vmem>>, vector<8x128xf32>,
    %c1_i32 = arith.constant 1 : i32
    %14 = arith.cmpi eq, %arg1, %c1_i32 : i32
    %15 = arith.extui %14 : i1 to i32
    %c0_i32_11 = arith.constant 0 : i32
    %16 = arith.cmpi ne, %15, %c0_i32_11 : i32
    scf.if %16 {
      %c0_12 = arith.constant 0 : index
      %c0_13 = arith.constant 0 : index
      %17 = vector.load %arg10[%c0_12, %c0_13] : memref<8x128xf32, #tpu.memory_space<vmem>>, vector<8x128xf32>
      %c0_14 = arith.constant 0 : index
      %c0_15 = arith.constant 0 : index
      %18 = vector.load %arg7[%c0_14, %c0_15] : memref<128x128xf32, #tpu.memory_space<vmem>>, vector<128x128xf32>
      %cst_16 = arith.constant dense<0.000000e+00> : vector<8x128xf32>
      %19 = tpu.matmul %17, %18, %cst_16 {dimension_numbers = #tpu.dot_dimension_numbers<[1], [0], [0], [1], [0, 0, 1, 1], [], []>} : vector<8x128xf32>, vector<128x128xf32>, vector<8x128xf32> -> vector<8x128xf32>
      %c0_17 = arith.constant 0 : index
      %c0_18 = arith.constant 0 : index
      %20 = vector.load %arg8[%c0_17, %c0_18] : memref<1x128xf32, #tpu.memory_space<vmem>>, vector<1x128xf32>
      %21 = vector.broadcast %20 : vector<1x128xf32> to vector<8x128xf32>
      %22 = arith.addf %19, %21 : vector<8x128xf32>
      %c0_19 = arith.constant 0 : index
      %c0_20 = arith.constant 0 : index
      %23 = vector.load %arg9[%c0_19, %c0_20] : memref<8x128xf32, #tpu.memory_space<vmem>>, vector<8x128xf32>
      tpu.vector_store %arg9[%c0_19, %c0_20], %22 {strides = array<i32>} : memref<8x128xf32, #tpu.memory_space<vmem>>, vector<8x128xf32>,
    } else {
    }
    return
  }
  func.func @transform_0(%arg0: i32, %arg1: i32) -> (i32, i32) {
    %c0_i32 = arith.constant 0 : i32
    %c0_i32_0 = arith.constant 0 : i32
    return %arg0, %c0_i32 : i32, i32
  }
  func.func @transform_1(%arg0: i32, %arg1: i32) -> (i32, i32) {
    %c0_i32 = arith.constant 0 : i32
    %c0_i32_0 = arith.constant 0 : i32
    %c0_i32_1 = arith.constant 0 : i32
    return %c0_i32, %c0_i32_0 : i32, i32
  }
  func.func @transform_2(%arg0: i32, %arg1: i32) -> (i32, i32) {
    %c0_i32 = arith.constant 0 : i32
    %c0_i32_0 = arith.constant 0 : i32
    %c0_i32_1 = arith.constant 0 : i32
    return %c0_i32, %c0_i32_0 : i32, i32
  }
  func.func @transform_3(%arg0: i32, %arg1: i32) -> (i32, i32, i32) {
    %c0_i32 = arith.constant 0 : i32
    %c0_i32_0 = arith.constant 0 : i32
    %c0_i32_1 = arith.constant 0 : i32
    return %arg1, %c0_i32, %c0_i32_0 : i32, i32, i32
  }
  func.func @transform_4(%arg0: i32, %arg1: i32) -> (i32, i32, i32) {
    %c0_i32 = arith.constant 0 : i32
    %c0_i32_0 = arith.constant 0 : i32
    %c0_i32_1 = arith.constant 0 : i32
    return %arg1, %c0_i32, %c0_i32_0 : i32, i32, i32
  }
  func.func @transform_5(%arg0: i32, %arg1: i32) -> (i32, i32) {
    %c0_i32 = arith.constant 0 : i32
    %c0_i32_0 = arith.constant 0 : i32
    %c0_i32_1 = arith.constant 0 : i32
    return %c0_i32, %c0_i32_0 : i32, i32
  }
  func.func @transform_6(%arg0: i32, %arg1: i32) -> (i32, i32) {
    %c0_i32 = arith.constant 0 : i32
    %c0_i32_0 = arith.constant 0 : i32
    %c0_i32_1 = arith.constant 0 : i32
    return %c0_i32, %c0_i32_0 : i32, i32
  }
  func.func @transform_7(%arg0: i32, %arg1: i32) -> (i32, i32) {
    %c0_i32 = arith.constant 0 : i32
    %c0_i32_0 = arith.constant 0 : i32
    return %arg0, %c0_i32 : i32, i32
  }
}

</mosaic_0001>

<bundles_post_ra>
// kernel: densenet_forward.1
= control target key start
LH: loop header
LB: loop body
LE: loop exit
PB: predicated region body
PF: predicated region fallthrough
CT: control target
= control target key end

     0   :  { %s1422_s0 = inlined_call_operand.vmem [shape: f32[8,128], index: 0, kind: input, shape index: {}]   ;;  %s1423_s1 = inlined_call_operand.hbm [shape: f32[128,128], index: 1, kind: input, shape index: {}]   ;;  %s1424_s2 = inlined_call_operand.vmem [shape: f32[1,128], index: 2, kind: input, shape index: {}]   ;;  %s1425_s3 = inlined_call_operand.hbm [shape: f32[2,128,128], index: 3, kind: input, shape index: {}]   ;;  %s1426_s4 = inlined_call_operand.vmem [shape: f32[2,1,128], index: 4, kind: input, shape index: {}]   ;;  %s1427_s5 = inlined_call_operand.hbm [shape: f32[128,128], index: 5, kind: input, shape index: {}]   ;;  %s1428_s6 = inlined_call_operand.vmem [shape: f32[1,128], index: 6, kind: input, shape index: {}]   ;;  %s1429_s7 = inlined_call_operand.vmem [shape: f32[8,128], index: 7, kind: output, shape index: {}]  }
   0x1   :  { %1434 = sst [smem:[#allocation11_spill]] %s1423_s1 }
   0x2   :  { %1435 = sst [smem:[#allocation12_spill]] %s1427_s5 }
   0x3   :  { %12 = vsyncpa [#allocation4], 0 }
   0x4   :  { %13 = vsyncpa [#allocation6], 0 }
   0x5   :  { %15 = vsyncpa [#allocation6 + $0x1], 0  ;;  %s1232_s24 = smov 0   ;;  %s1234_s25 = smov 0  }
   0x6   :  { %s1236_s26 = smov 0   ;;  %s1238_s27 = smov 0  }
   0x7   :  { %s1240_s28 = smov 0   ;;  %s1242_s29 = smov 0  }
   0x8 LB: > { %s1431_s30 = sadd.s32 4294967295, %s1179_s29   ;;  %p115_p0 = scmp.ne.s32.totalorder %s1167_s26, %s1163_s25  ;;  %s1179_s29 = sphi %s1242_s29, %s21_s29   ;;  %s1175_s28 = sphi %s1240_s28, %s1451_s28   ;;  %s1171_s27 = sphi %s1238_s27, %s1450_s27   ;;  %s1167_s26 = sphi %s1236_s26, %s1449_s26   ;;  %s1163_s25 = sphi %s1234_s25, %s1448_s25   ;;  %s1159_s24 = sphi %s1232_s24, %s1447_s24  }
   0x9   : > { %p116_p1 = scmp.eq.s32.totalorder %s1179_s29, 0  ;;  %p121_p2 = scmp.ne.s32.totalorder %s1163_s25, %s1159_s24 }
   0xa   : > { %p1267_p3 = scmp.eq.s32.totalorder %s1431_s30, 0  ;;  %p780_p4 = scmp.ge.s32.totalorder %s1179_s29, 1 }
   0xb   : > { %p117_p5 = por %p116_p1, %p115_p0  ;;  %p226_p6 = scmp.lt.s32.totalorder %s1179_s29, 3 }
   0xc   : > { %p1275_p7 = por %p1267_p3, %p121_p2  ;;  %s1181_s11 = smov [#allocation7]  }
   0xd   : > { %p1279_p8 = pnand %p780_p4, %p226_p6  ;;  %s261_s12 = sshll.u32 %s1181_s11, 4  ;;  %s262_s12 = int_to_ptr.vmem [resolvable:$true] %s261_s12 }
   0xe   : > { %s1437_s9 = scalar_select %p1275_p7, 1, 0 }
   0xf   : > { %p967_p9 = pneg %p1279_p8  ;;  %p980_p11 = scmp.lt.s32.totalorder %s1179_s29, 2 }
  0x10   : > { %s1052_s15 = scalar_lea.vmem %s262_s12, 2048  ;;  %p1060_p4 = scmp.lt.s32.totalorder %s262_s12, %s262_s12 }
  0x11   : > { %p1287_p10 = pnand %p967_p9, %p1267_p3  ;;  %p1292_p12 = pnand %p980_p11, %p117_p5 }
  0x12   : > { %p1053_p0 = scmp.ne.s32.totalorder %s262_s12, %s1052_s15  ;;  %p1061_p6 = scmp.lt.s32.totalorder %s1052_s15, %s1052_s15 }
  0x13   : > { %p1043_p13 = pneg %p1287_p10 }
  0x14   : > { %p1062_p9 = por %p1061_p6, %p1060_p4 }
  0x15   : > { %p1055_p1 = pnand %p1053_p0, %p1043_p13 }
  0x17   : > { %p1056_p2 = pneg %p1055_p1 }
  0x19   : > { %p1063_p7 = pnand %p1062_p9, %p1056_p2 }
  0x1b   : > { %1066 = shalt.err (!%p1063_p7)
}
  0x1c   : > { %s1432_s16 = smov 128   ;;  %s1433_s17 = smov 8  }
  0x1d   : > { %s1441_s5 = sld [smem:[#allocation12_spill]]  ;;  %s1184_s20 = smov [#allocation3]  }
  0x1e   : > { %s245_s21 = sshll.u32 %s1184_s20, 4  ;;  %s246_s21 = int_to_ptr.vmem [resolvable:$true] %s245_s21 }
  0x1f   : > { %s1078_s22 = scalar_lea.vmem %s246_s21, 2048  ;;  %p1086_p0 = scmp.lt.s32.totalorder %s246_s21, %s246_s21 }
  0x20   : > { %p1079_p5 = scmp.ne.s32.totalorder %s246_s21, %s1078_s22  ;;  %p1087_p1 = scmp.lt.s32.totalorder %s1078_s22, %s1078_s22 }
  0x22   : > { %p1081_p7 = pnand %p1079_p5, %p1043_p13  ;;  %p1088_p2 = por %p1087_p1, %p1086_p0 }
  0x23   : > { %973 = dma.hbm_to_vmem [thread:$0]  (!%p1287_p10), %s1441_s5, 2048, %s262_s12, [#allocation6], %s1432_s16, %s1432_s16, %s1433_s17  }
  0x24   : > { %p1082_p11 = pneg %p1081_p7 }
  0x26   : > { %p1089_p4 = pnand %p1088_p2, %p1082_p11 }
  0x28   : > { %1092 = shalt.err (!%p1089_p4)
}
  0x29   : > { %s1442_s1 = sld [smem:[#allocation11_spill]]  ;;  %s30_s11 = sadd.s32 1, %s1175_s28 }
  0x2a   : > { %p31_p13 = scmp.ge.s32.totalorder %s30_s11, 2  ;;  %s108_s12 = sadd.s32 1, %s1167_s26 }
  0x2b   : > { %s278_s15 = sand.u32 1, %s1179_s29   ;;  %s280_s13 = sand.u32 1, %s1167_s26  }
  0x2c   : > { %s1453_s11 = smov (%p31_p13, %s30_s11), 0  ;;  %s785_s18 = sshll.u32 %s280_s13, 7 }
  0x2d   : > { %s800_s19 = sshll.u32 %s1175_s28, 11  ;;  %s105_s20 = ssub.s32 %s1175_s28, %s1453_s11 }
  0x2e   : > { %p106_p6 = scmp.eq.s32.totalorder %s105_s20, 0  ;;  %s288_s24 = scalar_lea.hbm %s1425_s3, %s800_s19 }
  0x2f   : > { %970 = dma.hbm_to_vmem [thread:$0]  (!%p1287_p10), %s1442_s1, 2048, %s246_s21, [#allocation4], %s1432_s16, %s1432_s16, %s1433_s17  }
  0x30   : > { %s282_s30 = scalar_lea.vmem [#allocation5], %s785_s18  ;;  %s279_s16 = scalar_lea.sflag [#allocation6], %s278_s15 }
  0x31   : > { %s289_s5 = sshll.u32 %s282_s30, 4  ;;  %p1095_p10 = pneg %p1292_p12  ;;  %s290_s5 = int_to_ptr.vmem [resolvable:$true] %s289_s5 }
  0x32   : > { %s1333_s21 = scalar_select %p106_p6, %s1167_s26, %s108_s12  }
  0x33   : > { %s1106_s17 = scalar_lea.vmem %s290_s5, 2048  ;;  %s1185_s13 = smov [#allocation5]  }
  0x34   : > { %p1107_p9 = scmp.ne.s32.totalorder %s290_s5, %s1106_s17  ;;  %s1111_s1 = sshll.u32 %s1185_s13, 4  ;;  %s1112_s1 = int_to_ptr.vmem [resolvable:$false] %s1111_s1 }
  0x35   : > { %s1113_s20 = scalar_lea.vmem %s1112_s1, 4096  ;;  %p1114_p11 = scmp.lt.s32.totalorder %s290_s5, %s1112_s1 }
  0x36   : > { %p1109_p5 = pnand %p1107_p9, %p1095_p10  ;;  %p1115_p0 = scmp.lt.s32.totalorder %s1113_s20, %s1106_s17 }
  0x38   : > { %p1110_p7 = pneg %p1109_p5  ;;  %p1116_p1 = por %p1115_p0, %p1114_p11 }
  0x3a   : > { %p1117_p2 = pnand %p1116_p1, %p1110_p7 }
  0x3c   : > { %1120 = shalt.err (!%p1117_p2)
}
  0x3d   : > { %s1443_s30 = smov 8   ;;  %s1444_s12 = smov 128  }
  0x3e   : > { %977 = dma.hbm_to_vmem [thread:$0]  (!%p1292_p12), %s288_s24, 2048, %s290_s5, %s279_s16, %s1444_s12, %s1444_s12, %s1443_s30  }
  0x3f   : > { %307 = sbr.rel (%p1279_p8) target bundleno = 776 (0x308), region = 48 }
  0x44   : > { %1146 = dma.done.wait (%p1267_p3), [#allocation4], 2048  }
  0x45   : > { %1148 = vsyncadd (%p1267_p3), [#allocation4], 4294965248  ;;  %s1445_s1 = sadd.s32 4294967295, %s1179_s29   ;;  %s315_s15 = sand.u32 1, %s1163_s25  }
  0x46   : > { %s313_s17 = sand.u32 1, %s1445_s1   ;;  %s790_s14 = sshll.u32 %s315_s15, 7 }
  0x47   : > { %s314_s18 = scalar_lea.sflag [#allocation6], %s313_s17  ;;  %s1351_s19 = scalar_lea.vmem [#allocation5], %s790_s14 }
  0x48   : > { %p1446_p12 = scmp.ne.s32.totalorder %s1437_s9, 0 }
  0x4a   : > { %1150 = dma.done.wait (%p1446_p12), %s314_s18, 2048  }
  0x4b   : > { %1152 = vsyncadd (%p1446_p12), %s314_s18, 4294965248 }
  0x4c   : > { %1154 = dma.done.wait (%p1267_p3), [#allocation6], 2048  }
  0x4d   : > { %1156 = vsyncadd (%p1267_p3), [#allocation6], 4294965248  ;;  %p362_p8 = scmp.lt.s32.totalorder %s1171_s27, 1  ;;  %p792_p4 = scmp.ne.s32.totalorder %s1171_s27, 0 }
  0x4f   : > { %s1363_s5 = scalar_select %p362_p8, %s1171_s27, 1 }
  0x50   : > { %372 = sbr.rel (%p792_p4) target bundleno = 316 (0x13c), region = 64 }
  0x51   : > { %s364_s22 = scalar_lea.vmem %s1426_s4, %s1363_s5 }
  0x55   : > { %v389_v0 = vld [vmem:[#allocation3 + $0x78] sm:$0xff]  ;;  %v1186_v1 = vmov 0.0   ;;  %v388_v2 = vld [vmem:[#allocation3 + $0x70] sm:$0xff]  ;;  %vm1187_vm0 = vmmov 0   ;;  %v387_v3 = vld [vmem:[#allocation3 + $0x68] sm:$0xff] }
  0x56   : > { %852 = vmatprep.subr.mxu0 %v1186_v1  ;;  %884 = vmatprep.mubr.msk.f32.mxu0 %vm1187_vm0, %v1186_v1  ;;  %v386_v4 = vld [vmem:[#allocation3 + $0x60] sm:$0xff]  ;;  %v385_v5 = vld [vmem:[#allocation3 + $0x58] sm:$0xff]  ;;  %v384_v6 = vld [vmem:[#allocation3 + $0x50] sm:$0xff] }
  0x57   : > { %853 = vmatpush3.msra.mxu0 %v389_v0  ;;  %v383_v7 = vld [vmem:[#allocation3 + $0x48] sm:$0xff]  ;;  %v382_v8 = vld [vmem:[#allocation3 + $0x40] sm:$0xff]  ;;  %v381_v9 = vld [vmem:[#allocation3 + $0x38] sm:$0xff] }
  0x58   : > { %854 = vmatprep.subr.mxu0 %v1186_v1  ;;  %v380_v10 = vld [vmem:[#allocation3 + $0x30] sm:$0xff]  ;;  %v379_v11 = vld [vmem:[#allocation3 + $0x28] sm:$0xff]  ;;  %v378_v12 = vld [vmem:[#allocation3 + $0x20] sm:$0xff] }
  0x59   : > { %855 = vmatpush3.msra.mxu0 %v388_v2  ;;  %v377_v13 = vld [vmem:[#allocation3 + $0x18] sm:$0xff]  ;;  %v376_v14 = vld [vmem:[#allocation3 + $0x10] sm:$0xff]  ;;  %v375_v15 = vld [vmem:[#allocation3 + $0x8] sm:$0xff] }
  0x5a   : > { %856 = vmatprep.subr.mxu0 %v1186_v1  ;;  %v374_v16 = vld [vmem:[#allocation3] sm:$0xff]  ;;  %v373_v17 = vld [vmem:[%s1422_s0] sm:$0xff] }
  0x5b   : > { %857 = vmatpush3.msra.mxu0 %v387_v3  ;;  %v793_v18 = vld [vmem:[%s1424_s2] ss:$0 sm:$0xff] }
  0x5c   : > { %858 = vmatprep.subr.mxu0 %v1186_v1 }
  0x5d   : > { %859 = vmatpush3.msra.mxu0 %v386_v4 }
  0x5e   : > { %860 = vmatprep.subr.mxu0 %v1186_v1 }
  0x5f   : > { %861 = vmatpush3.msra.mxu0 %v385_v5 }
  0x60   : > { %862 = vmatprep.subr.mxu0 %v1186_v1 }
  0x61   : > { %863 = vmatpush3.msra.mxu0 %v384_v6 }
  0x62   : > { %864 = vmatprep.subr.mxu0 %v1186_v1 }
  0x63   : > { %865 = vmatpush3.msra.mxu0 %v383_v7 }
  0x64   : > { %866 = vmatprep.subr.mxu0 %v1186_v1 }
  0x65   : > { %867 = vmatpush3.msra.mxu0 %v382_v8 }
  0x66   : > { %868 = vmatprep.subr.mxu0 %v1186_v1 }
  0x67   : > { %869 = vmatpush3.msra.mxu0 %v381_v9 }
  0x68   : > { %870 = vmatprep.subr.mxu0 %v1186_v1 }
  0x69   : > { %871 = vmatpush3.msra.mxu0 %v380_v10 }
  0x6a   : > { %872 = vmatprep.subr.mxu0 %v1186_v1 }
  0x6b   : > { %873 = vmatpush3.msra.mxu0 %v379_v11 }
  0x6c   : > { %874 = vmatprep.subr.mxu0 %v1186_v1 }
  0x6d   : > { %875 = vmatpush3.msra.mxu0 %v378_v12 }
  0x6e   : > { %876 = vmatprep.subr.mxu0 %v1186_v1 }
  0x6f   : > { %877 = vmatpush3.msra.mxu0 %v377_v13 }
  0x70   : > { %878 = vmatprep.subr.mxu0 %v1186_v1 }
  0x71   : > { %879 = vmatpush3.msra.mxu0 %v376_v14 }
  0x72   : > { %880 = vmatprep.subr.mxu0 %v1186_v1 }
  0x73   : > { %881 = vmatpush3.msra.mxu0 %v375_v15 }
  0x74   : > { %882 = vmatprep.subr.mxu0 %v1186_v1 }
  0x75   : > { %883 = vmatpush3.msra.mxu0 %v374_v16 }
  0x76   : > { %885 = vmatmul.mubr.f32.vlgmr.msra.gmra.mxu0 %v373_v17 }
 0x136   : > { %v463_v19 = vpop.f32.mrf.mxu0 }
 0x137   : > { %v464_v20 = vadd.f32 %v793_v18, %v463_v19 }
 0x138   : > { %v886_v21 = vpop.f32.mrf.mxu0 }
 0x139   : > { %v467_v22 = vmax.f32 %v464_v20, 0.0 }
 0x13b   : > { %468 = vst [vmem:[#allocation2] sm:$0xff] %v467_v22 }
 0x13c PF: > { %v485_v23 = vld [vmem:[%s1351_s19 + $0x78] sm:$0xff]  ;;  %v1188_v24 = vmov 0.0   ;;  %v484_v25 = vld [vmem:[%s1351_s19 + $0x70] sm:$0xff]  ;;  %vm1189_vm1 = vmmov 0   ;;  %v483_v26 = vld [vmem:[%s1351_s19 + $0x68] sm:$0xff]  ;;  %p795_p3 = scmp.ne.s32.totalorder %s1171_s27, 1 }
 0x13d   : > { %887 = vmatprep.subr.mxu0 %v1188_v24  ;;  %919 = vmatprep.mubr.msk.f32.mxu0 %vm1189_vm1, %v1188_v24  ;;  %v482_v27 = vld [vmem:[%s1351_s19 + $0x60] sm:$0xff]  ;;  %v481_v28 = vld [vmem:[%s1351_s19 + $0x58] sm:$0xff]  ;;  %v480_v29 = vld [vmem:[%s1351_s19 + $0x50] sm:$0xff] }
 0x13e   : > { %888 = vmatpush3.msra.mxu0 %v485_v23  ;;  %v479_v30 = vld [vmem:[%s1351_s19 + $0x48] sm:$0xff]  ;;  %v478_v31 = vld [vmem:[%s1351_s19 + $0x40] sm:$0xff]  ;;  %v477_v32 = vld [vmem:[%s1351_s19 + $0x38] sm:$0xff] }
 0x13f   : > { %889 = vmatprep.subr.mxu0 %v1188_v24  ;;  %v476_v33 = vld [vmem:[%s1351_s19 + $0x30] sm:$0xff]  ;;  %v475_v34 = vld [vmem:[%s1351_s19 + $0x28] sm:$0xff]  ;;  %v474_v35 = vld [vmem:[%s1351_s19 + $0x20] sm:$0xff] }
 0x140   : > { %890 = vmatpush3.msra.mxu0 %v484_v25  ;;  %v473_v36 = vld [vmem:[%s1351_s19 + $0x18] sm:$0xff]  ;;  %v472_v37 = vld [vmem:[%s1351_s19 + $0x10] sm:$0xff]  ;;  %v471_v38 = vld [vmem:[%s1351_s19 + $0x8] sm:$0xff] }
 0x141   : > { %891 = vmatprep.subr.mxu0 %v1188_v24  ;;  %v470_v39 = vld [vmem:[%s1351_s19] sm:$0xff]  ;;  %v794_v41 = vld [vmem:[%s364_s22] ss:$0 sm:$0xff] }
 0x142   : > { %892 = vmatpush3.msra.mxu0 %v483_v26  ;;  %v469_v40 = vld [vmem:[#allocation2] sm:$0xff] }
 0x143   : > { %893 = vmatprep.subr.mxu0 %v1188_v24 }
 0x144   : > { %894 = vmatpush3.msra.mxu0 %v482_v27 }
 0x145   : > { %895 = vmatprep.subr.mxu0 %v1188_v24 }
 0x146   : > { %896 = vmatpush3.msra.mxu0 %v481_v28 }
 0x147   : > { %897 = vmatprep.subr.mxu0 %v1188_v24 }
 0x148   : > { %898 = vmatpush3.msra.mxu0 %v480_v29 }
 0x149   : > { %899 = vmatprep.subr.mxu0 %v1188_v24 }
 0x14a   : > { %900 = vmatpush3.msra.mxu0 %v479_v30 }
 0x14b   : > { %901 = vmatprep.subr.mxu0 %v1188_v24 }
 0x14c   : > { %902 = vmatpush3.msra.mxu0 %v478_v31 }
 0x14d   : > { %903 = vmatprep.subr.mxu0 %v1188_v24 }
 0x14e   : > { %904 = vmatpush3.msra.mxu0 %v477_v32 }
 0x14f   : > { %905 = vmatprep.subr.mxu0 %v1188_v24 }
 0x150   : > { %906 = vmatpush3.msra.mxu0 %v476_v33 }
 0x151   : > { %907 = vmatprep.subr.mxu0 %v1188_v24 }
 0x152   : > { %908 = vmatpush3.msra.mxu0 %v475_v34 }
 0x153   : > { %909 = vmatprep.subr.mxu0 %v1188_v24 }
 0x154   : > { %910 = vmatpush3.msra.mxu0 %v474_v35 }
 0x155   : > { %911 = vmatprep.subr.mxu0 %v1188_v24 }
 0x156   : > { %912 = vmatpush3.msra.mxu0 %v473_v36 }
 0x157   : > { %913 = vmatprep.subr.mxu0 %v1188_v24 }
 0x158   : > { %914 = vmatpush3.msra.mxu0 %v472_v37 }
 0x159   : > { %915 = vmatprep.subr.mxu0 %v1188_v24 }
 0x15a   : > { %916 = vmatpush3.msra.mxu0 %v471_v38 }
 0x15b   : > { %917 = vmatprep.subr.mxu0 %v1188_v24 }
 0x15c   : > { %918 = vmatpush3.msra.mxu0 %v470_v39 }
 0x15d   : > { %920 = vmatmul.mubr.f32.vlgmr.msra.gmra.mxu0 %v469_v40 }
 0x21d   : > { %v559_v42 = vpop.f32.mrf.mxu0 }
 0x21e   : > { %v560_v43 = vadd.f32 %v794_v41, %v559_v42  ;;  %568 = sbr.rel (%p795_p3) target bundleno = 776 (0x308), region = 68 }
 0x21f   : > { %v921_v44 = vpop.f32.mrf.mxu0 }
 0x220   : > { %v563_v45 = vmax.f32 %v560_v43, 0.0 }
 0x222   : > { %564 = vst [vmem:[#allocation2] sm:$0xff] %v563_v45 }
 0x223   : > { %v585_v46 = vld [vmem:[#allocation7 + $0x78] sm:$0xff]  ;;  %v1190_v47 = vmov 0.0   ;;  %v584_v48 = vld [vmem:[#allocation7 + $0x70] sm:$0xff]  ;;  %vm1191_vm2 = vmmov 0   ;;  %v583_v49 = vld [vmem:[#allocation7 + $0x68] sm:$0xff] }
 0x224   : > { %922 = vmatprep.subr.mxu0 %v1190_v47  ;;  %954 = vmatprep.mubr.msk.f32.mxu0 %vm1191_vm2, %v1190_v47  ;;  %v582_v50 = vld [vmem:[#allocation7 + $0x60] sm:$0xff]  ;;  %v581_v51 = vld [vmem:[#allocation7 + $0x58] sm:$0xff]  ;;  %v580_v52 = vld [vmem:[#allocation7 + $0x50] sm:$0xff] }
 0x225   : > { %923 = vmatpush3.msra.mxu0 %v585_v46  ;;  %v579_v53 = vld [vmem:[#allocation7 + $0x48] sm:$0xff]  ;;  %v578_v54 = vld [vmem:[#allocation7 + $0x40] sm:$0xff]  ;;  %v577_v55 = vld [vmem:[#allocation7 + $0x38] sm:$0xff] }
 0x226   : > { %924 = vmatprep.subr.mxu0 %v1190_v47  ;;  %v576_v56 = vld [vmem:[#allocation7 + $0x30] sm:$0xff]  ;;  %v575_v57 = vld [vmem:[#allocation7 + $0x28] sm:$0xff]  ;;  %v574_v58 = vld [vmem:[#allocation7 + $0x20] sm:$0xff] }
 0x227   : > { %925 = vmatpush3.msra.mxu0 %v584_v48  ;;  %v573_v59 = vld [vmem:[#allocation7 + $0x18] sm:$0xff]  ;;  %v572_v60 = vld [vmem:[#allocation7 + $0x10] sm:$0xff]  ;;  %v571_v61 = vld [vmem:[#allocation7 + $0x8] sm:$0xff] }
 0x228   : > { %926 = vmatprep.subr.mxu0 %v1190_v47  ;;  %v570_v62 = vld [vmem:[#allocation7] sm:$0xff]  ;;  %v796_v0 = vld [vmem:[%s1428_s6] ss:$0 sm:$0xff] }
 0x229   : > { %927 = vmatpush3.msra.mxu0 %v583_v49  ;;  %v569_v63 = vld [vmem:[#allocation2] sm:$0xff] }
 0x22a   : > { %928 = vmatprep.subr.mxu0 %v1190_v47 }
 0x22b   : > { %929 = vmatpush3.msra.mxu0 %v582_v50 }
 0x22c   : > { %930 = vmatprep.subr.mxu0 %v1190_v47 }
 0x22d   : > { %931 = vmatpush3.msra.mxu0 %v581_v51 }
 0x22e   : > { %932 = vmatprep.subr.mxu0 %v1190_v47 }
 0x22f   : > { %933 = vmatpush3.msra.mxu0 %v580_v52 }
 0x230   : > { %934 = vmatprep.subr.mxu0 %v1190_v47 }
 0x231   : > { %935 = vmatpush3.msra.mxu0 %v579_v53 }
 0x232   : > { %936 = vmatprep.subr.mxu0 %v1190_v47 }
 0x233   : > { %937 = vmatpush3.msra.mxu0 %v578_v54 }
 0x234   : > { %938 = vmatprep.subr.mxu0 %v1190_v47 }
 0x235   : > { %939 = vmatpush3.msra.mxu0 %v577_v55 }
 0x236   : > { %940 = vmatprep.subr.mxu0 %v1190_v47 }
 0x237   : > { %941 = vmatpush3.msra.mxu0 %v576_v56 }
 0x238   : > { %942 = vmatprep.subr.mxu0 %v1190_v47 }
 0x239   : > { %943 = vmatpush3.msra.mxu0 %v575_v57 }
 0x23a   : > { %944 = vmatprep.subr.mxu0 %v1190_v47 }
 0x23b   : > { %945 = vmatpush3.msra.mxu0 %v574_v58 }
 0x23c   : > { %946 = vmatprep.subr.mxu0 %v1190_v47 }
 0x23d   : > { %947 = vmatpush3.msra.mxu0 %v573_v59 }
 0x23e   : > { %948 = vmatprep.subr.mxu0 %v1190_v47 }
 0x23f   : > { %949 = vmatpush3.msra.mxu0 %v572_v60 }
 0x240   : > { %950 = vmatprep.subr.mxu0 %v1190_v47 }
 0x241   : > { %951 = vmatpush3.msra.mxu0 %v571_v61 }
 0x242   : > { %952 = vmatprep.subr.mxu0 %v1190_v47 }
 0x243   : > { %953 = vmatpush3.msra.mxu0 %v570_v62 }
 0x244   : > { %955 = vmatmul.mubr.f32.vlgmr.msra.gmra.mxu0 %v569_v63 }
 0x304   : > { %v659_v1 = vpop.f32.mrf.mxu0 }
 0x305   : > { %v660_v2 = vadd.f32 %v796_v0, %v659_v1 }
 0x306   : > { %v956_v3 = vpop.f32.mrf.mxu0 }
 0x307   : > { %663 = vst [vmem:[%s1429_s7] sm:$0xff] %v660_v2 }
 0x308 PF: > { %s21_s29 = sadd.s32 1, %s1179_s29   ;;  %s1447_s24 = smov %s1163_s25 }
 0x309   : > { %p18_p13 = scmp.ge.s32.totalorder %s21_s29, 4   ;;  %s1448_s25 = smov %s1167_s26 }
 0x30a   : > { %s1449_s26 = smov %s1333_s21  ;;  %s1450_s27 = smov %s1175_s28 }
 0x30b   : > { %s1451_s28 = smov %s1453_s11  ;;  %20 = sbr.rel (!%p18_p13) target bundleno = 8 (0x8), region = 111 }
 0x310   :  { %683 = vsyncpa [#allocation4], 1 }
 0x311   :  { %685 = vsyncpa [#allocation4 + $0x1], 1 }
 0x312   :  { %686 = vsyncpa [#allocation6], 1 }
 0x313   :  { %688 = vsyncpa [#allocation6 + $0x1], 1 }

</bundles_post_ra>
